<compile_context>
chip_gen: v6e
topology: v6e:2x2x1
jax: 0.10.0
libtpu: 0.0.40
codegen_flags: <defaults>
</compile_context>

<pallas_src>
import functools

import jax
import jax.numpy as jnp
from jax.experimental import pallas as pl
from jax.experimental.pallas import tpu as pltpu

_LANES = 128
_SUBLANES = 8


def _gcn_loss_kernel(z_ref, v_ref, p_ref, pi_ref, out_ref, acc_ref, *, inv_b):
    i = pl.program_id(0)

    @pl.when(i == 0)
    def _init():
        acc_ref[...] = jnp.zeros_like(acc_ref)

    # Upcast in-kernel; inputs may travel over HBM as bf16.
    p = p_ref[...].astype(jnp.float32)
    pi = pi_ref[...].astype(jnp.float32)

    # Guard log(0): p may underflow to 0 after softmax with extreme logits.
    tiny = jnp.finfo(jnp.float32).tiny
    contrib = pi * jnp.log(jnp.maximum(p, tiny))          # (tb, 128)  VPU + EUP
    # Per-lane partial sums only; the cross-lane reduction happens once at finalize.
    acc_ref[...] += jnp.sum(contrib, axis=0, keepdims=True)   # (1, 128)

    @pl.when(i == pl.num_programs(0) - 1)
    def _finalize():
        z = z_ref[0, 0]
        v = v_ref[0, 0]
        mse = (z - v) * (z - v)
        ce = -jnp.sum(acc_ref[...]) * inv_b               # mean over the true batch B
        out_ref[0, 0] = mse + ce


def gcn_loss(z_prime, v_a, p, pi, *, block_rows=512):
    """z_prime, v_a: scalars; p, pi: (B, A) float32 or bfloat16."""
    if p.shape != pi.shape:
        raise Exception(
            "Length of policy vector (p) does not match length of enhanced policy vector (pi)"
        )
    B, A = p.shape
    total = B * A

    # Lane-dense layout: flatten (B, A) -> (rows, 128).
    nrows = pl.cdiv(total, _LANES)
    nrows = ((nrows + _SUBLANES - 1) // _SUBLANES) * _SUBLANES  # sublane-align
    tb = min(block_rows, nrows)                                  # multiple of 8
    n_tiles = pl.cdiv(nrows, tb)
    padded_rows = n_tiles * tb
    pad = padded_rows * _LANES - total

    p_flat = p.reshape(-1)
    pi_flat = pi.reshape(-1)
    if pad:
        # p padded with 1, pi padded with 0  =>  pi * log(p) == 0 for the tail.
        p_flat = jnp.pad(p_flat, (0, pad), constant_values=1)
        pi_flat = jnp.pad(pi_flat, (0, pad), constant_values=0)
    p2d = p_flat.reshape(padded_rows, _LANES)
    pi2d = pi_flat.reshape(padded_rows, _LANES)

    z = jnp.asarray(z_prime, jnp.float32).reshape(1, 1)
    v = jnp.asarray(v_a, jnp.float32).reshape(1, 1)

    kernel = functools.partial(_gcn_loss_kernel, inv_b=float(1.0 / B))

    out = pl.pallas_call(
        kernel,
        out_shape=jax.ShapeDtypeStruct((1, 1), jnp.float32),
        grid=(n_tiles,),
        in_specs=[
            pl.BlockSpec((1, 1), lambda i: (0, 0), memory_space=pltpu.SMEM),
            pl.BlockSpec((1, 1), lambda i: (0, 0), memory_space=pltpu.SMEM),
            pl.BlockSpec((tb, _LANES), lambda i: (i, 0)),
            pl.BlockSpec((tb, _LANES), lambda i: (i, 0)),
        ],
        out_specs=pl.BlockSpec((1, 1), lambda i: (0, 0), memory_space=pltpu.SMEM),
        scratch_shapes=[pltpu.VMEM((1, _LANES), jnp.float32)],
        compiler_params=pltpu.CompilerParams(
            dimension_semantics=("arbitrary",),      # reduction axis
            vmem_limit_bytes=16 * 1024 * 1024,       # safe under v5e/v6e/v7x scoped defaults
        ),
    )(z, v, p2d, pi2d)
    return out[0, 0]


if __name__ == "__main__":
    key = jax.random.PRNGKey(0)
    k1, k2, k3, k4 = jax.random.split(key, 4)

    B, A = 8, 32  # batch of policy vectors, number of actions

    # scalars
    z_prime = jax.random.uniform(k1, (), jnp.float32)
    v_a = jax.random.uniform(k2, (), jnp.float32)

    # p: network policy (valid probability distribution so log(p) is finite)
    p = jax.nn.softmax(jax.random.normal(k3, (B, A), jnp.float32), axis=1)
    # pi: MCTS-refined policy
    pi = jax.nn.softmax(jax.random.normal(k4, (B, A), jnp.float32), axis=1)

    loss = gcn_loss(z_prime, v_a, p, pi)
    jax.block_until_ready(loss)

    ref = (z_prime - v_a) ** 2 + jnp.mean(-jnp.sum(pi * jnp.log(p), axis=1))
    assert jnp.allclose(loss, ref, atol=1e-5, rtol=1e-5), (loss, ref)

    # Second check: ragged shape exercising lane padding + multi-tile accumulation.
    k5, k6 = jax.random.split(k4)
    B2, A2 = 33, 200
    p2 = jax.nn.softmax(jax.random.normal(k5, (B2, A2), jnp.float32), axis=1)
    pi2 = jax.nn.softmax(jax.random.normal(k6, (B2, A2), jnp.float32), axis=1)
    loss2 = gcn_loss(z_prime, v_a, p2, pi2, block_rows=16)  # forces 4 grid steps
    jax.block_until_ready(loss2)
    ref2 = (z_prime - v_a) ** 2 + jnp.mean(-jnp.sum(pi2 * jnp.log(p2), axis=1))
    assert jnp.allclose(loss2, ref2, atol=1e-4, rtol=1e-4), (loss2, ref2)

    print("KERNEL_OK")
</pallas_src>

<mosaic_0001>
module attributes {stable_mosaic.version = 11 : i64} {
  func.func @_gcn_loss_kernel(%arg0: i32, %arg1: memref<1x1xf32, #tpu.memory_space<smem>>, %arg2: memref<1x1xf32, #tpu.memory_space<smem>>, %arg3: memref<8x128xf32, #tpu.memory_space<vmem>>, %arg4: memref<8x128xf32, #tpu.memory_space<vmem>>, %arg5: memref<1x1xf32, #tpu.memory_space<smem>>, %arg6: memref<1x128xf32, #tpu.memory_space<vmem>>) attributes {dimension_semantics = [#tpu.dimension_semantics<arbitrary>], iteration_bounds = array<i64: 1>, scalar_prefetch = 0 : i64, scratch_operands = 1 : i64, tpu.core_type = #tpu.core_type<tc>, window_params = [{transform_indices = @transform_0, window_bounds = array<i64: 1, 1>}, {transform_indices = @transform_1, window_bounds = array<i64: 1, 1>}, {transform_indices = @transform_2, window_bounds = array<i64: 8, 128>}, {transform_indices = @transform_3, window_bounds = array<i64: 8, 128>}, {transform_indices = @transform_4, window_bounds = array<i64: 1, 1>}]} {
    %c0_i32 = arith.constant 0 : i32
    %0 = arith.cmpi eq, %arg0, %c0_i32 : i32
    %1 = arith.extui %0 : i1 to i32
    %c0_i32_0 = arith.constant 0 : i32
    %2 = arith.cmpi ne, %1, %c0_i32_0 : i32
    scf.if %2 {
      %cst_11 = arith.constant 0.000000e+00 : f32
      %17 = vector.broadcast %cst_11 : f32 to vector<1x128xf32>
      %c0_12 = arith.constant 0 : index
      %c0_13 = arith.constant 0 : index
      %18 = vector.load %arg6[%c0_12, %c0_13] : memref<1x128xf32, #tpu.memory_space<vmem>>, vector<1x128xf32>
      tpu.vector_store %arg6[%c0_12, %c0_13], %17 {strides = array<i32>} : memref<1x128xf32, #tpu.memory_space<vmem>>, vector<1x128xf32>,
    } else {
    }
    %c0 = arith.constant 0 : index
    %c0_1 = arith.constant 0 : index
    %3 = vector.load %arg3[%c0, %c0_1] : memref<8x128xf32, #tpu.memory_space<vmem>>, vector<8x128xf32>
    %c0_2 = arith.constant 0 : index
    %c0_3 = arith.constant 0 : index
    %4 = vector.load %arg4[%c0_2, %c0_3] : memref<8x128xf32, #tpu.memory_space<vmem>>, vector<8x128xf32>
    %cst = arith.constant 1.17549435E-38 : f32
    %5 = vector.broadcast %cst : f32 to vector<8x128xf32>
    %6 = arith.maximumf %3, %5 : vector<8x128xf32>
    %7 = math.log %6 : vector<8x128xf32>
    %8 = arith.mulf %4, %7 : vector<8x128xf32>
    %c0_4 = arith.constant 0 : index
    %c0_5 = arith.constant 0 : index
    %9 = vector.load %arg6[%c0_4, %c0_5] : memref<1x128xf32, #tpu.memory_space<vmem>>, vector<1x128xf32>
    %cst_6 = arith.constant dense<0.000000e+00> : vector<128xf32>
    %10 = vector.multi_reduction <add>, %8, %cst_6 [0] : vector<8x128xf32> to vector<128xf32>
    %11 = vector.shape_cast %10 : vector<128xf32> to vector<1x128xf32>
    %12 = arith.addf %9, %11 : vector<1x128xf32>
    %c0_7 = arith.constant 0 : index
    %c0_8 = arith.constant 0 : index
    %13 = vector.load %arg6[%c0_7, %c0_8] : memref<1x128xf32, #tpu.memory_space<vmem>>, vector<1x128xf32>
    tpu.vector_store %arg6[%c0_7, %c0_8], %12 {strides = array<i32>} : memref<1x128xf32, #tpu.memory_space<vmem>>, vector<1x128xf32>,
    %c0_i32_9 = arith.constant 0 : i32
    %14 = arith.cmpi eq, %arg0, %c0_i32_9 : i32
    %15 = arith.extui %14 : i1 to i32
    %c0_i32_10 = arith.constant 0 : i32
    %16 = arith.cmpi ne, %15, %c0_i32_10 : i32
    scf.if %16 {
      %c0_11 = arith.constant 0 : index
      %c0_12 = arith.constant 0 : index
      %17 = memref.load %arg1[%c0_11, %c0_12] : memref<1x1xf32, #tpu.memory_space<smem>>
      %c0_13 = arith.constant 0 : index
      %c0_14 = arith.constant 0 : index
      %18 = memref.load %arg2[%c0_13, %c0_14] : memref<1x1xf32, #tpu.memory_space<smem>>
      %19 = arith.subf %17, %18 : f32
      %20 = arith.subf %17, %18 : f32
      %21 = arith.mulf %19, %20 : f32
      %c0_15 = arith.constant 0 : index
      %c0_16 = arith.constant 0 : index
      %22 = vector.load %arg6[%c0_15, %c0_16] : memref<1x128xf32, #tpu.memory_space<vmem>>, vector<1x128xf32>
      %23 = vector.shape_cast %22 : vector<1x128xf32> to vector<1x1x128xf32>
      %cst_17 = arith.constant dense<0.000000e+00> : vector<1xf32>
      %24 = vector.multi_reduction <add>, %23, %cst_17 [1, 2] : vector<1x1x128xf32> to vector<1xf32>
      %25 = vector.shape_cast %24 : vector<1xf32> to vector<1x1x1xf32>
      %26 = vector.extract %25[0, 0, 0] : f32 from vector<1x1x1xf32>
      %cst_18 = arith.constant 0.000000e+00 : f32
      %27 = arith.subf %cst_18, %26 : f32
      %cst_19 = arith.constant 1.250000e-01 : f32
      %28 = arith.mulf %27, %cst_19 : f32
      %29 = arith.addf %21, %28 : f32
      %c0_20 = arith.constant 0 : index
      %c0_21 = arith.constant 0 : index
      %30 = memref.load %arg5[%c0_20, %c0_21] : memref<1x1xf32, #tpu.memory_space<smem>>
      memref.store %29, %arg5[%c0_20, %c0_21] : memref<1x1xf32, #tpu.memory_space<smem>>
    } else {
    }
    return
  }
  func.func @transform_0(%arg0: i32) -> (i32, i32) {
    %c0_i32 = arith.constant 0 : i32
    %c0_i32_0 = arith.constant 0 : i32
    %c0_i32_1 = arith.constant 0 : i32
    return %c0_i32, %c0_i32_0 : i32, i32
  }
  func.func @transform_1(%arg0: i32) -> (i32, i32) {
    %c0_i32 = arith.constant 0 : i32
    %c0_i32_0 = arith.constant 0 : i32
    %c0_i32_1 = arith.constant 0 : i32
    return %c0_i32, %c0_i32_0 : i32, i32
  }
  func.func @transform_2(%arg0: i32) -> (i32, i32) {
    %c0_i32 = arith.constant 0 : i32
    %c0_i32_0 = arith.constant 0 : i32
    return %arg0, %c0_i32 : i32, i32
  }
  func.func @transform_3(%arg0: i32) -> (i32, i32) {
    %c0_i32 = arith.constant 0 : i32
    %c0_i32_0 = arith.constant 0 : i32
    return %arg0, %c0_i32 : i32, i32
  }
  func.func @transform_4(%arg0: i32) -> (i32, i32) {
    %c0_i32 = arith.constant 0 : i32
    %c0_i32_0 = arith.constant 0 : i32
    %c0_i32_1 = arith.constant 0 : i32
    return %c0_i32, %c0_i32_0 : i32, i32
  }
}

</mosaic_0001>

<bundles_post_ra>
// kernel: tpu_custom_call.1
= control target key start
LH: loop header
LB: loop body
LE: loop exit
PB: predicated region body
PF: predicated region fallthrough
CT: control target
= control target key end

     0   :  { %11 = vsyncpa [#allocation6], 0  ;;  %s209_s0 = inlined_call_operand.<no memory space> [shape: f32[1,1], index: 0, kind: input, shape index: {}]   ;;  %s210_s1 = inlined_call_operand.<no memory space> [shape: f32[1,1], index: 1, kind: input, shape index: {}]   ;;  %s211_s2 = inlined_call_operand.hbm [shape: f32[8,128], index: 2, kind: input, shape index: {}]   ;;  %s212_s3 = inlined_call_operand.hbm [shape: f32[8,128], index: 3, kind: input, shape index: {}]   ;;  %s213_s4 = inlined_call_operand.hbm [shape: f32[1,1], index: 4, kind: output, shape index: {}]  }
   0x1   :  { %12 = vsyncpa [#allocation9], 0 }
   0x2   :  { %13 = vsyncpa [#allocation7], 0  ;;  %s165_s15 = smov [#allocation5]   ;;  %s166_s17 = smov [#allocation8]  }
   0x3   :  { %s24_s16 = sshll.u32 %s165_s15, 4  ;;  %s34_s18 = sshll.u32 %s166_s17, 4  ;;  %s25_s16 = int_to_ptr.vmem [resolvable:$true] %s24_s16  ;;  %s35_s18 = int_to_ptr.vmem [resolvable:$true] %s34_s18 }
   0x4   :  { %s119_s19 = scalar_lea.vmem %s25_s16, 128  ;;  %p124_p1 = scmp.lt.s32.totalorder %s25_s16, %s25_s16 }
   0x5   :  { %p120_p0 = scmp.ne.s32.totalorder %s25_s16, %s119_s19  ;;  %p125_p2 = scmp.lt.s32.totalorder %s119_s19, %s119_s19 }
   0x7   :  { %p126_p3 = por %p125_p2, %p124_p1 }
   0x9   :  { %p127_p4 = pnand %p126_p3, %p120_p0 }
   0xb   :  { %130 = shalt.err (!%p127_p4)
}
   0xc   :  { %27 = dma.hbm_to_vmem [thread:$0]  %s211_s2, 128, %s25_s16, [#allocation6]  }
   0xd   :  { %s139_s22 = scalar_lea.vmem %s35_s18, 128  ;;  %p144_p6 = scmp.lt.s32.totalorder %s35_s18, %s35_s18 }
   0xe   :  { %p140_p5 = scmp.ne.s32.totalorder %s35_s18, %s139_s22  ;;  %p145_p7 = scmp.lt.s32.totalorder %s139_s22, %s139_s22 }
  0x10   :  { %p146_p8 = por %p145_p7, %p144_p6 }
  0x12   :  { %p147_p9 = pnand %p146_p8, %p140_p5 }
  0x14   :  { %150 = shalt.err (!%p147_p9)
}
  0x15   :  { %37 = dma.hbm_to_vmem [thread:$0]  %s212_s3, 128, %s35_s18, [#allocation9]  }
  0x16   :  { %159 = dma.done.wait [#allocation6], 128  }
  0x17   :  { %160 = vsyncadd [#allocation6], 4294967168 }
  0x18   :  { %161 = dma.done.wait [#allocation9], 128  }
  0x19   :  { %162 = vsyncadd [#allocation9], 4294967168  ;;  %v167_v0 = vmov 0.0   ;;  %v49_v1 = vld [vmem:[#allocation5] sm:$0xff]  ;;  %v50_v4 = vld [vmem:[#allocation8] sm:$0xff]  ;;  %vm72_vm0 = vcmask 1040384   ;;  %s69_s27 = ssub.f32 %s209_s0, %s210_s1 }
  0x1a   :  { %48 = vst [vmem:[#allocation2] sm:$0x1] %v167_v0  ;;  %v51_v2 = vmax.f32 %v49_v1, 1.1754944e-38  ;;  %s168_s7 = smov [#allocation10]  }
  0x1b   :  { %s70_s29 = smul.f32 %s69_s27, %s69_s27 }
  0x1c   :  { %109 = vlog2.f32 %v51_v2 }
  0x21   :  { %v55_v12 = vld [vmem:[#allocation2] sm:$0x1] }
  0x29   :  { %v110_v3 = vpop.eup %109 }
  0x2a   :  { %v53_v5 = vmul.f32 0.6931472, %v110_v3 }
  0x2c   :  { %v54_v6 = vmul.f32 %v53_v5, %v50_v4 }
  0x2e   :  { %v56_v7 = vrot.slane %v54_v6, 4 }
  0x30   :  { %v57_v8 = vadd.f32 %v56_v7, %v54_v6 }
  0x32   :  { %v58_v9 = vrot.slane %v57_v8, 2 }
  0x34   :  { %v59_v10 = vadd.f32 %v58_v9, %v57_v8 }
  0x36   :  { %v60_v11 = vrot.slane %v59_v10, 1 }
  0x38   :  { %v61_v13 = vadd.f32 %v60_v11, %v59_v10 }
  0x3a   :  { %v62_v14 = vadd.f32 %v61_v13, %v55_v12 }
  0x3c   :  { %63 = vst [vmem:[#allocation2] sm:$0x1] %v62_v14 }
  0x43   :  { %v71_v15 = vld [vmem:[#allocation2] sm:$0x1] }
  0x44   :  { %v73_v16 = vsel %vm72_vm0, %v71_v15, 0.0 }
  0x45   :  { %74 = vadd.xlane.f32.xlu0 %v73_v16 }
  0xce   :  { %v75_v17 = vpop.xlane.xlu0 %74 }
  0xcf   :  { %v76_v18 = vrot.slane %v75_v17, 4 }
  0xd1   :  { %v77_v19 = vadd.f32 %v76_v18, %v75_v17 }
  0xd3   :  { %v78_v20 = vrot.slane %v77_v19, 2 }
  0xd5   :  { %v79_v21 = vadd.f32 %v78_v20, %v77_v19 }
  0xd7   :  { %v80_v22 = vrot.slane %v79_v21, 1 }
  0xd9   :  { %v81_v23 = vadd.f32 %v80_v22, %v79_v21 }
  0xdb   :  { %103 = vpush %v81_v23 }
 0x10c   :  { %s104_s28 = spop %103 }
 0x10d   :  { %s83_s30 = ssub.f32 0.0, %s104_s28 }
 0x10f   :  { %s84_s5 = smul.f32 0.125, %s83_s30 }
 0x111   :  { %s85_s6 = sadd.f32 %s84_s5, %s70_s29 }
 0x113   :  { %87 = sst [smem:[#allocation10]] %s85_s6 }
 0x114   :  { %95 = dma.smem_to_hbm %s168_s7, 16, %s213_s4, [#allocation7]  }
 0x115   :  { %163 = dma.done.wait [#allocation7], 16  }
 0x116   :  { %164 = vsyncadd [#allocation7], 4294967280 }
 0x117   :  { %99 = sfence }
 0x118   :  { %100 = vsyncpa [#allocation6], 1 }
 0x119   :  { %101 = vsyncpa [#allocation9], 1 }
 0x11a   :  { %102 = vsyncpa [#allocation7], 1 }

</bundles_post_ra>
